<compile_context>
chip_gen: v5e
topology: v5e:2x2
jax: 0.10.0
libtpu: 0.0.40
codegen_flags: <defaults>
</compile_context>

<pallas_src>
import functools

import jax
import jax.numpy as jnp
from jax import lax
from jax.experimental import pallas as pl
from jax.experimental.pallas import tpu as pltpu


# ----------------------------- Pallas kernel -------------------------------

def _sigmoid(z, *, approx):
    # Numerically stable logistic: exp of a non-positive argument only.
    e = jnp.exp(-jnp.abs(z))                      # in (0, 1], never overflows
    num = jnp.where(z >= 0.0, 1.0, e)
    den = 1.0 + e
    if approx:
        # the divide rides the EUP slot (free while the kernel is HBM-bound)
        return num * pl.reciprocal(den, approx=True)
    return num / den


def cbam_kernel(x_ref, w1t_ref, w2t_ref, ma_ref, mm_ref, o_ref, *, hw, approx):
    # x_ref  : (Bt, C, HWp)  input batch block
    # w1t_ref: (C, hid)      first FC weight, transposed   (bf16 or f32)
    # w2t_ref: (hid, C)      second FC weight, transposed  (bf16 or f32)
    # ma_ref : (HWp, HWp)    Toeplitz matrix of the 7x7 conv, avg channel (f32)
    # mm_ref : (HWp, HWp)    Toeplitz matrix of the 7x7 conv, max channel (f32)
    # o_ref  : (Bt, C, HWp)
    bt, _, hwp = x_ref.shape
    x = x_ref[...].astype(jnp.float32)                       # (Bt, C, HWp)

    # --------------- channel attention (batched over the whole block) -------
    if hw == hwp:
        avg_c = jnp.mean(x, axis=2)                          # (Bt, C)
        max_c = jnp.max(x, axis=2)                           # (Bt, C)
    else:
        # zero-padded lanes: mask the max, rescale the sum for the mean
        lane = lax.broadcasted_iota(jnp.int32, (1, 1, hwp), 2)
        neg = jnp.finfo(jnp.float32).min
        avg_c = jnp.sum(x, axis=2) * (1.0 / hw)
        max_c = jnp.max(jnp.where(lane < hw, x, neg), axis=2)

    pooled = jnp.concatenate([avg_c, max_c], axis=0)         # (2*Bt, C)
    mm_dt = w1t_ref.dtype
    h = jnp.dot(pooled.astype(mm_dt), w1t_ref[...],
                preferred_element_type=jnp.float32)          # (2*Bt, hid)
    h = jnp.maximum(h, 0.0)                                  # ReLU
    y = jnp.dot(h.astype(mm_dt), w2t_ref[...],
                preferred_element_type=jnp.float32)          # (2*Bt, C)
    ca = _sigmoid(y[:bt] + y[bt:], approx=approx)[:, :, None]  # (Bt, C, 1)

    # --------------- spatial attention ---------------------------------------
    # x1 is transient: its live range ends at the pooled maps; only ca and the
    # (Bt, HWp) maps survive across the conv matmuls (no Bt*C*HW live slabs).
    x1 = x * ca                                              # (Bt, C, HWp)
    avg_sp = jnp.mean(x1, axis=1)                            # (Bt, HWp)
    max_sp = jnp.max(x1, axis=1)                             # (Bt, HWp)
    conv = (jnp.dot(avg_sp, ma_ref[...], preferred_element_type=jnp.float32) +
            jnp.dot(max_sp, mm_ref[...], preferred_element_type=jnp.float32))
    sa = _sigmoid(conv, approx=approx)[:, None, :]           # (Bt, 1, HWp)

    # single fused, lane-dense block store
    o_ref[...] = (x * ca * sa).astype(o_ref.dtype)


# ------------------------------ JAX glue ------------------------------------

def _conv_to_matmul_matrix(w_c, H, W, HWp, ksize=7):
    """Build M (HWp, HWp) s.t. flat_out = flat_in @ M equals a 'same' 2-D conv
    (stride 1, zero padding ksize//2) with kernel w_c of shape (ksize, ksize)."""
    pad = ksize // 2
    HW = H * W
    idx = jnp.arange(HW)
    qh, qw = idx // W, idx % W                   # rows: input pixel q, cols: output pixel p
    kh = qh[:, None] - qh[None, :] + pad
    kw = qw[:, None] - qw[None, :] + pad
    valid = (kh >= 0) & (kh < ksize) & (kw >= 0) & (kw < ksize)
    m = jnp.where(valid,
                  w_c[jnp.clip(kh, 0, ksize - 1), jnp.clip(kw, 0, ksize - 1)],
                  0.0).astype(jnp.float32)
    if HWp != HW:
        m = jnp.pad(m, ((0, HWp - HW), (0, HWp - HW)))
    return m


def _chip_defaults():
    """Chip-aware VMEM cap and preferred minimum grid length."""
    try:
        kind = jax.devices()[0].device_kind.lower()
    except Exception:
        kind = ""
    if "v7" in kind:
        # 2 TensorCores share the grid; 64 MiB physical VMEM -> leave headroom.
        return {"min_steps": 4, "vmem_cap": 56 << 20}
    if "v6" in kind or "v5" in kind:
        # single TensorCore, 128 MiB physical VMEM: biggest fitting block wins.
        return {"min_steps": 1, "vmem_cap": 100 << 20}
    return {"min_steps": 2, "vmem_cap": 56 << 20}


def _pick_batch_block(B, per_sample_vmem, budget, min_steps):
    divisors = sorted((d for d in range(1, B + 1) if B % d == 0), reverse=True)
    fitting = [d for d in divisors if d * per_sample_vmem <= budget] or [1]
    bt = fitting[0]                                   # largest fitting block
    target = min(min_steps, B)
    for d in fitting:                                 # keep >= target grid steps
        if B // d >= target:
            bt = d
            break
    return bt


def cbam_pallas(x, w1, w2, w_conv, *, batch_block=None, precise=False):
    """CBAM forward.  x: (B, C, H, W); w1: (C//r, C); w2: (C, C//r); w_conv: (2,7,7).

    precise=True keeps the channel MLP in f32 and uses an exact divide in the
    sigmoid (tight verification); the default uses bf16 MLP weights and the
    EUP approximate reciprocal.
    """
    B, C, H, W = x.shape
    HW = H * W
    HWp = ((HW + 127) // 128) * 128
    hid = w1.shape[0]

    xf = x.reshape(B, C, HW)
    if HWp != HW:
        xf = jnp.pad(xf, ((0, 0), (0, 0), (0, HWp - HW)))

    mxu_dtype = jnp.float32 if precise else jnp.bfloat16
    w1t = w1.T.astype(mxu_dtype)                       # (C, hid)
    w2t = w2.T.astype(mxu_dtype)                       # (hid, C)
    # Toeplitz matrices kept in f32 (small vs x traffic; 49-term accumulation).
    m_avg = _conv_to_matmul_matrix(w_conv[0], H, W, HWp)
    m_max = _conv_to_matmul_matrix(w_conv[1], H, W, HWp)

    itemsize = jnp.dtype(x.dtype).itemsize
    per_sample_vmem = 4 * C * HWp * itemsize           # double-buffered in + out block
    weight_bytes = (2 * HWp * HWp * 4                  # single-buffered Toeplitz pair
                    + 2 * C * hid * jnp.dtype(mxu_dtype).itemsize)
    cfg = _chip_defaults()
    budget = cfg["vmem_cap"] - weight_bytes - (4 << 20)
    Bt = batch_block if batch_block is not None else _pick_batch_block(
        B, per_sample_vmem, budget, cfg["min_steps"])
    assert B % Bt == 0, "batch_block must divide the batch size"
    vmem_limit = int(min(cfg["vmem_cap"],
                         max(32 << 20,
                             Bt * per_sample_vmem + weight_bytes + (8 << 20))))

    kernel = functools.partial(cbam_kernel, hw=HW, approx=not precise)
    # grid-invariant operands: fetched once, single-buffered (no wasted VMEM)
    const = functools.partial(pl.BlockSpec, pipeline_mode=pl.Buffered(1))

    out_flat = pl.pallas_call(
        kernel,
        out_shape=jax.ShapeDtypeStruct((B, C, HWp), x.dtype),
        grid_spec=pltpu.PrefetchScalarGridSpec(
            num_scalar_prefetch=0,
            grid=(B // Bt,),
            in_specs=[
                pl.BlockSpec((Bt, C, HWp), lambda b: (b, 0, 0)),
                const((C, hid), lambda b: (0, 0)),
                const((hid, C), lambda b: (0, 0)),
                const((HWp, HWp), lambda b: (0, 0)),
                const((HWp, HWp), lambda b: (0, 0)),
            ],
            out_specs=pl.BlockSpec((Bt, C, HWp), lambda b: (b, 0, 0)),
        ),
        compiler_params=pltpu.CompilerParams(
            dimension_semantics=("parallel",),
            vmem_limit_bytes=vmem_limit),
    )(xf, w1t, w2t, m_avg, m_max)

    if HWp != HW:
        out_flat = out_flat[:, :, :HW]
    return out_flat.reshape(B, C, H, W)


# --------------------------- pure-JAX reference ------------------------------

def cbam_reference(x, w1, w2, w_conv):
    avg = jnp.mean(x, axis=(2, 3))                           # (B, C)
    mx = jnp.max(x, axis=(2, 3))                             # (B, C)

    def fc(v):
        return jnp.maximum(v @ w1.T, 0.0) @ w2.T

    ca = jax.nn.sigmoid(fc(avg) + fc(mx))[:, :, None, None]  # (B, C, 1, 1)
    x1 = x * ca

    avg_sp = jnp.mean(x1, axis=1, keepdims=True)             # (B, 1, H, W)
    max_sp = jnp.max(x1, axis=1, keepdims=True)              # (B, 1, H, W)
    sp = jnp.concatenate([avg_sp, max_sp], axis=1)           # (B, 2, H, W)
    conv = lax.conv_general_dilated(
        sp, w_conv[None], window_strides=(1, 1),
        padding=((3, 3), (3, 3)),
        dimension_numbers=("NCHW", "OIHW", "NCHW"))          # (B, 1, H, W)
    sa = jax.nn.sigmoid(conv)
    return x1 * sa


# --------------------------------- main --------------------------------------

if __name__ == "__main__":
    def run_case(B, C, H, W, reduction_ratio=16):
        hid = max(C // reduction_ratio, 1)
        key = jax.random.PRNGKey(0)
        kx, k1, k2, kc = jax.random.split(key, 4)
        x = jax.random.normal(kx, (B, C, H, W), dtype=jnp.float32)
        # deterministic synthetic parameters (the module has no bias terms)
        w1 = 0.1 * jax.random.normal(k1, (hid, C), dtype=jnp.float32)      # Linear(C -> C//r)
        w2 = 0.1 * jax.random.normal(k2, (C, hid), dtype=jnp.float32)      # Linear(C//r -> C)
        w_conv = 0.1 * jax.random.normal(kc, (2, 7, 7), dtype=jnp.float32)  # Conv2d(2, 1, 7)

        ref = cbam_reference(x, w1, w2, w_conv)

        # exact-math path (f32 MXU operands, exact sigmoid divide)
        out_p = jax.block_until_ready(cbam_pallas(x, w1, w2, w_conv, precise=True))
        err_p = float(jnp.max(jnp.abs(out_p - ref)))
        assert err_p < 2e-3, f"precise mismatch ({B},{C},{H},{W}): {err_p}"

        # fast path (bf16 channel-MLP weights, EUP approx reciprocal)
        out_f = jax.block_until_ready(cbam_pallas(x, w1, w2, w_conv, precise=False))
        err_f = float(jnp.max(jnp.abs(out_f - ref)))
        assert err_f < 6e-2, f"bf16 mismatch ({B},{C},{H},{W}): {err_f}"

    run_case(2, 32, 16, 16)   # HW = 256: already lane-aligned
    run_case(2, 32, 10, 10)   # HW = 100: exercises the padded / masked path
    print("KERNEL_OK")
</pallas_src>

<mosaic_0001>
module attributes {stable_mosaic.version = 11 : i64} {
  func.func @cbam_kernel(%arg0: i32, %arg1: memref<1x32x256xf32, #tpu.memory_space<vmem>>, %arg2: memref<32x2xf32, #tpu.memory_space<vmem>>, %arg3: memref<2x32xf32, #tpu.memory_space<vmem>>, %arg4: memref<256x256xf32, #tpu.memory_space<vmem>>, %arg5: memref<256x256xf32, #tpu.memory_space<vmem>>, %arg6: memref<1x32x256xf32, #tpu.memory_space<vmem>>) attributes {dimension_semantics = [#tpu.dimension_semantics<parallel>], iteration_bounds = array<i64: 2>, scalar_prefetch = 0 : i64, scratch_operands = 0 : i64, tpu.core_type = #tpu.core_type<tc>, window_params = [{transform_indices = @transform_0, window_bounds = array<i64: 1, 32, 256>}, {pipeline_mode = #tpu.pipeline_mode<synchronous>, transform_indices = @transform_1, window_bounds = array<i64: 32, 2>}, {pipeline_mode = #tpu.pipeline_mode<synchronous>, transform_indices = @transform_2, window_bounds = array<i64: 2, 32>}, {pipeline_mode = #tpu.pipeline_mode<synchronous>, transform_indices = @transform_3, window_bounds = array<i64: 256, 256>}, {pipeline_mode = #tpu.pipeline_mode<synchronous>, transform_indices = @transform_4, window_bounds = array<i64: 256, 256>}, {transform_indices = @transform_5, window_bounds = array<i64: 1, 32, 256>}]} {
    %c0 = arith.constant 0 : index
    %c0_0 = arith.constant 0 : index
    %c0_1 = arith.constant 0 : index
    %0 = vector.load %arg1[%c0, %c0_0, %c0_1] : memref<1x32x256xf32, #tpu.memory_space<vmem>>, vector<1x32x256xf32>
    %cst = arith.constant dense<0.000000e+00> : vector<1x32xf32>
    %1 = vector.multi_reduction <add>, %0, %cst [2] : vector<1x32x256xf32> to vector<1x32xf32>
    %cst_2 = arith.constant 2.560000e+02 : f32
    %2 = vector.broadcast %cst_2 : f32 to vector<1x32xf32>
    %3 = arith.divf %1, %2 : vector<1x32xf32>
    %cst_3 = arith.constant dense<0xFF800000> : vector<1x32xf32>
    %4 = vector.multi_reduction <maximumf>, %0, %cst_3 [2] : vector<1x32x256xf32> to vector<1x32xf32>
    %5 = tpu.concatenate %3, %4 in 0 : vector<1x32xf32>, vector<1x32xf32> -> vector<2x32xf32>
    %c0_4 = arith.constant 0 : index
    %c0_5 = arith.constant 0 : index
    %6 = vector.load %arg2[%c0_4, %c0_5] : memref<32x2xf32, #tpu.memory_space<vmem>>, vector<32x2xf32>
    %cst_6 = arith.constant dense<0.000000e+00> : vector<2x2xf32>
    %7 = tpu.matmul %5, %6, %cst_6 {dimension_numbers = #tpu.dot_dimension_numbers<[1], [0], [0], [1], [0, 0, 1, 1], [], []>} : vector<2x32xf32>, vector<32x2xf32>, vector<2x2xf32> -> vector<2x2xf32>
    %cst_7 = arith.constant 0.000000e+00 : f32
    %8 = vector.broadcast %cst_7 : f32 to vector<2x2xf32>
    %9 = arith.maximumf %7, %8 : vector<2x2xf32>
    %c0_8 = arith.constant 0 : index
    %c0_9 = arith.constant 0 : index
    %10 = vector.load %arg3[%c0_8, %c0_9] : memref<2x32xf32, #tpu.memory_space<vmem>>, vector<2x32xf32>
    %cst_10 = arith.constant dense<0.000000e+00> : vector<2x32xf32>
    %11 = tpu.matmul %9, %10, %cst_10 {dimension_numbers = #tpu.dot_dimension_numbers<[1], [0], [0], [1], [0, 0, 1, 1], [], []>} : vector<2x2xf32>, vector<2x32xf32>, vector<2x32xf32> -> vector<2x32xf32>
    %12 = vector.extract_strided_slice %11 {offsets = [0, 0], sizes = [1, 32], strides = [1, 1]} : vector<2x32xf32> to vector<1x32xf32>
    %13 = vector.extract_strided_slice %11 {offsets = [1, 0], sizes = [1, 32], strides = [1, 1]} : vector<2x32xf32> to vector<1x32xf32>
    %14 = arith.addf %12, %13 : vector<1x32xf32>
    %15 = math.absf %14 : vector<1x32xf32>
    %cst_11 = arith.constant 0.000000e+00 : f32
    %16 = vector.broadcast %cst_11 : f32 to vector<1x32xf32>
    %17 = arith.subf %16, %15 : vector<1x32xf32>
    %18 = math.exp %17 : vector<1x32xf32>
    %cst_12 = arith.constant 0.000000e+00 : f32
    %19 = vector.broadcast %cst_12 : f32 to vector<1x32xf32>
    %20 = arith.cmpf oge, %14, %19 : vector<1x32xf32>
    %cst_13 = arith.constant 1.000000e+00 : f32
    %21 = vector.broadcast %cst_13 : f32 to vector<1x32xf32>
    %22 = arith.select %20, %21, %18 : vector<1x32xi1>, vector<1x32xf32>
    %cst_14 = arith.constant 1.000000e+00 : f32
    %23 = vector.broadcast %cst_14 : f32 to vector<1x32xf32>
    %24 = arith.addf %23, %18 : vector<1x32xf32>
    %25 = arith.divf %22, %24 : vector<1x32xf32>
    %26 = vector.shape_cast %25 : vector<1x32xf32> to vector<1x32x1xf32>
    %27 = vector.broadcast %26 : vector<1x32x1xf32> to vector<1x32x256xf32>
    %28 = arith.mulf %0, %27 : vector<1x32x256xf32>
    %cst_15 = arith.constant dense<0.000000e+00> : vector<1x256xf32>
    %29 = vector.multi_reduction <add>, %28, %cst_15 [1] : vector<1x32x256xf32> to vector<1x256xf32>
    %cst_16 = arith.constant 3.200000e+01 : f32
    %30 = vector.broadcast %cst_16 : f32 to vector<1x256xf32>
    %31 = arith.divf %29, %30 : vector<1x256xf32>
    %cst_17 = arith.constant dense<0xFF800000> : vector<1x256xf32>
    %32 = vector.multi_reduction <maximumf>, %28, %cst_17 [1] : vector<1x32x256xf32> to vector<1x256xf32>
    %c0_18 = arith.constant 0 : index
    %c0_19 = arith.constant 0 : index
    %33 = vector.load %arg4[%c0_18, %c0_19] : memref<256x256xf32, #tpu.memory_space<vmem>>, vector<256x256xf32>
    %cst_20 = arith.constant dense<0.000000e+00> : vector<1x256xf32>
    %34 = tpu.matmul %31, %33, %cst_20 {dimension_numbers = #tpu.dot_dimension_numbers<[1], [0], [0], [1], [0, 0, 1, 1], [], []>} : vector<1x256xf32>, vector<256x256xf32>, vector<1x256xf32> -> vector<1x256xf32>
    %c0_21 = arith.constant 0 : index
    %c0_22 = arith.constant 0 : index
    %35 = vector.load %arg5[%c0_21, %c0_22] : memref<256x256xf32, #tpu.memory_space<vmem>>, vector<256x256xf32>
    %cst_23 = arith.constant dense<0.000000e+00> : vector<1x256xf32>
    %36 = tpu.matmul %32, %35, %cst_23 {dimension_numbers = #tpu.dot_dimension_numbers<[1], [0], [0], [1], [0, 0, 1, 1], [], []>} : vector<1x256xf32>, vector<256x256xf32>, vector<1x256xf32> -> vector<1x256xf32>
    %37 = arith.addf %34, %36 : vector<1x256xf32>
    %38 = math.absf %37 : vector<1x256xf32>
    %cst_24 = arith.constant 0.000000e+00 : f32
    %39 = vector.broadcast %cst_24 : f32 to vector<1x256xf32>
    %40 = arith.subf %39, %38 : vector<1x256xf32>
    %41 = math.exp %40 : vector<1x256xf32>
    %cst_25 = arith.constant 0.000000e+00 : f32
    %42 = vector.broadcast %cst_25 : f32 to vector<1x256xf32>
    %43 = arith.cmpf oge, %37, %42 : vector<1x256xf32>
    %cst_26 = arith.constant 1.000000e+00 : f32
    %44 = vector.broadcast %cst_26 : f32 to vector<1x256xf32>
    %45 = arith.select %43, %44, %41 : vector<1x256xi1>, vector<1x256xf32>
    %cst_27 = arith.constant 1.000000e+00 : f32
    %46 = vector.broadcast %cst_27 : f32 to vector<1x256xf32>
    %47 = arith.addf %46, %41 : vector<1x256xf32>
    %48 = arith.divf %45, %47 : vector<1x256xf32>
    %49 = vector.shape_cast %48 : vector<1x256xf32> to vector<1x1x256xf32>
    %50 = vector.broadcast %26 : vector<1x32x1xf32> to vector<1x32x256xf32>
    %51 = arith.mulf %0, %50 : vector<1x32x256xf32>
    %52 = vector.broadcast %49 : vector<1x1x256xf32> to vector<1x32x256xf32>
    %53 = arith.mulf %51, %52 : vector<1x32x256xf32>
    %c0_28 = arith.constant 0 : index
    %c0_29 = arith.constant 0 : index
    %c0_30 = arith.constant 0 : index
    %54 = vector.load %arg6[%c0_28, %c0_29, %c0_30] : memref<1x32x256xf32, #tpu.memory_space<vmem>>, vector<1x32x256xf32>
    tpu.vector_store %arg6[%c0_28, %c0_29, %c0_30], %53 {strides = array<i32>} : memref<1x32x256xf32, #tpu.memory_space<vmem>>, vector<1x32x256xf32>,
    return
  }
  func.func @transform_0(%arg0: i32) -> (i32, i32, i32) {
    %c0_i32 = arith.constant 0 : i32
    %c0_i32_0 = arith.constant 0 : i32
    %c0_i32_1 = arith.constant 0 : i32
    return %arg0, %c0_i32, %c0_i32_0 : i32, i32, i32
  }
  func.func @transform_1(%arg0: i32) -> (i32, i32) {
    %c0_i32 = arith.constant 0 : i32
    %c0_i32_0 = arith.constant 0 : i32
    %c0_i32_1 = arith.constant 0 : i32
    return %c0_i32, %c0_i32_0 : i32, i32
  }
  func.func @transform_2(%arg0: i32) -> (i32, i32) {
    %c0_i32 = arith.constant 0 : i32
    %c0_i32_0 = arith.constant 0 : i32
    %c0_i32_1 = arith.constant 0 : i32
    return %c0_i32, %c0_i32_0 : i32, i32
  }
  func.func @transform_3(%arg0: i32) -> (i32, i32) {
    %c0_i32 = arith.constant 0 : i32
    %c0_i32_0 = arith.constant 0 : i32
    %c0_i32_1 = arith.constant 0 : i32
    return %c0_i32, %c0_i32_0 : i32, i32
  }
  func.func @transform_4(%arg0: i32) -> (i32, i32) {
    %c0_i32 = arith.constant 0 : i32
    %c0_i32_0 = arith.constant 0 : i32
    %c0_i32_1 = arith.constant 0 : i32
    return %c0_i32, %c0_i32_0 : i32, i32
  }
  func.func @transform_5(%arg0: i32) -> (i32, i32, i32) {
    %c0_i32 = arith.constant 0 : i32
    %c0_i32_0 = arith.constant 0 : i32
    %c0_i32_1 = arith.constant 0 : i32
    return %arg0, %c0_i32, %c0_i32_0 : i32, i32, i32
  }
}

</mosaic_0001>

<bundles_post_ra>
// kernel: tpu_custom_call.1
= control target key start
LH: loop header
LB: loop body
LE: loop exit
PB: predicated region body
PF: predicated region fallthrough
CT: control target
= control target key end

     0   :  { %10 = vsyncpa [#allocation3], 0  ;;  %s1552_s0 = inlined_call_operand.hbm [shape: f32[2,32,256], index: 0, kind: input, shape index: {}]   ;;  %s1553_s1 = inlined_call_operand.vmem [shape: f32[32,2], index: 1, kind: input, shape index: {}]   ;;  %s1554_s2 = inlined_call_operand.vmem [shape: f32[2,32], index: 2, kind: input, shape index: {}]   ;;  %s1555_s3 = inlined_call_operand.hbm [shape: f32[256,256], index: 3, kind: input, shape index: {}]   ;;  %s1556_s4 = inlined_call_operand.hbm [shape: f32[256,256], index: 4, kind: input, shape index: {}]   ;;  %s1557_s5 = inlined_call_operand.hbm [shape: f32[2,32,256], index: 5, kind: output, shape index: {}]  }
   0x1   :  { %12 = vsyncpa [#allocation3 + $0x1], 0 }
   0x2   :  { %13 = vsyncpa [#allocation6], 0 }
   0x3   :  { %14 = vsyncpa [#allocation4], 0 }
   0x4   :  { %16 = vsyncpa [#allocation4 + $0x1], 0  ;;  %s1292_s18 = smov 0   ;;  %s1294_s19 = smov 0  }
   0x5   :  { %s1296_s20 = smov 0   ;;  %s1298_s21 = smov 0  }
   0x6 LB: > { %s1313_s22 = sadd.s32 4294967295, %s1252_s21   ;;  %s975_s23 = sadd.s32 4294967294, %s1252_s21   ;;  %s1252_s21 = sphi %s1298_s21, %s1569_s21   ;;  %s1248_s20 = sphi %s1296_s20, %s1568_s20   ;;  %s1244_s19 = sphi %s1294_s19, %s1567_s19   ;;  %s1240_s18 = sphi %s1292_s18, %s1566_s18  }
   0x7   : > { %p42_p0 = scmp.ne.s32.totalorder %s1244_s19, %s1240_s18  ;;  %p43_p1 = scmp.eq.s32.totalorder %s1313_s22, 0 }
   0x8   : > { %p150_p2 = scmp.eq.s32.totalorder %s1313_s22, 1  ;;  %p156_p3 = scmp.eq.s32.totalorder %s975_s23, 1 }
   0x9   : > { %p1322_p4 = por %p43_p1, %p42_p0  ;;  %p976_p5 = scmp.ge.s32.totalorder %s1252_s21, 1 }
   0xa   : > { %p1327_p6 = por %p156_p3, %p42_p0  ;;  %p163_p7 = scmp.lt.s32.totalorder %s1252_s21, 3 }
   0xb   : > { %s180_s28 = sshll.u32 %s1555_s3, 4  ;;  %s1254_s30 = smov [#allocation5]   ;;  %s181_s28 = int_to_ptr.hbm [resolvable:$true] %s180_s28 }
   0xc   : > { %p1335_p8 = pnand %p976_p5, %p163_p7  ;;  %s182_s6 = sshll.u32 %s1254_s30, 4  ;;  %s183_s6 = int_to_ptr.vmem [resolvable:$true] %s182_s6 }
   0xd   : > { %s194_s9 = sshll.u32 %s1556_s4, 4  ;;  %s1558_s10 = smov 256   ;;  %s195_s9 = int_to_ptr.hbm [resolvable:$true] %s194_s9 }
   0xe   : > { %p1010_p9 = pneg %p1335_p8  ;;  %s1256_s11 = smov 16  }
   0xf   : > { %s1257_s12 = smov [#allocation7]   ;;  %s1354_s14 = sadd.s32 1, %s1252_s21  }
  0x10   : > { %p1011_p10 = pnand %p1010_p9, %p43_p1  ;;  %s196_s13 = sshll.u32 %s1257_s12, 4  ;;  %s197_s13 = int_to_ptr.vmem [resolvable:$true] %s196_s13 }
  0x11   : > { %s29_s15 = sadd.s32 1, %s1248_s20  ;;  %s26_s16 = ssub.s32 %s1252_s21, %s1354_s14 }
  0x12   : > { %1013 = dma.hbm_to_vmem [thread:$0]  (!%p1011_p10), %s181_s28, 8192, %s183_s6, [#allocation6], %s1558_s10, %s1558_s10, %s1256_s11  }
  0x13   : > { %1016 = dma.hbm_to_vmem [thread:$0]  (!%p1011_p10), %s195_s9, 8192, %s197_s13, [#allocation6], %s1558_s10, %s1558_s10, %s1256_s11  }
  0x14   : > { %p36_p12 = scmp.ne.s32.totalorder %s1248_s20, %s1244_s19  ;;  %p27_p13 = scmp.eq.s32.totalorder %s26_s16, 0 }
  0x15   : > { %p37_p0 = scmp.eq.s32.totalorder %s1252_s21, 0  ;;  %p1027_p5 = scmp.lt.s32.totalorder %s1252_s21, 2 }
  0x16   : > { %p1364_p3 = por %p150_p2, %p36_p12  ;;  %s210_s26 = sand.u32 1, %s1248_s20  }
  0x17   : > { %s1370_s23 = scalar_select %p27_p13, %s1248_s20, %s29_s15  }
  0x18   : > { %p38_p7 = por %p37_p0, %p36_p12  ;;  %s980_s27 = sshll.u32 %s210_s26, 6 }
  0x19   : > { %s996_s28 = sshll.u32 %s1252_s21, 6  ;;  %s214_s8 = scalar_lea.vmem [#allocation2], %s980_s27 }
  0x1a   : > { %s219_s7 = scalar_lea.hbm %s1552_s0, %s996_s28  ;;  %s222_s9 = sshll.u32 %s214_s8, 4  ;;  %s223_s9 = int_to_ptr.vmem [resolvable:$true] %s222_s9 }
  0x1b   : > { %s220_s12 = sshll.u32 %s219_s7, 4  ;;  %p1377_p2 = pnand %p1027_p5, %p38_p7  ;;  %s221_s12 = int_to_ptr.hbm [resolvable:$true] %s220_s12 }
  0x1c   : > { %s211_s15 = scalar_lea.sflag [#allocation3], %s210_s26  ;;  %s1152_s16 = sshra.s32 %s221_s12, 4  ;;  %s1153_s16 = int_to_ptr.hbm [resolvable:$true] %s1152_s16 }
  0x1d   : > { %s1154_s10 = scalar_lea.hbm %s1153_s16, 64  ;;  %p1156_p10 = pneg %p1377_p2 }
  0x1e   : > { %p1155_p9 = scmp.ne.s32.totalorder %s1153_s16, %s1154_s10  ;;  %s1159_s30 = scalar_lea.hbm %s1552_s0, 128 }
  0x1f   : > { %p1160_p0 = scmp.lt.s32.totalorder %s1153_s16, %s1552_s0  ;;  %p1161_p5 = scmp.lt.s32.totalorder %s1159_s30, %s1154_s10 }
  0x20   : > { %p1157_p12 = pnand %p1156_p10, %p1155_p9 }
  0x21   : > { %p1162_p7 = por %p1161_p5, %p1160_p0 }
  0x22   : > { %p1158_p13 = pneg %p1157_p12 }
  0x24   : > { %p1163_p11 = pnand %p1162_p7, %p1158_p13 }
  0x26   : > { %1166 = shalt.err (!%p1163_p11)
}
  0x27   : > { %s1564_s26 = smov 256   ;;  %234 = sbr.rel (%p1335_p8) target bundleno = 805 (0x325), region = 40 }
  0x28   : > { %1020 = dma.hbm_to_vmem [thread:$0]  (!%p1377_p2), %s221_s12, 1024, %s223_s9, %s211_s15, %s1564_s26, %s1564_s26, %s1256_s11  }
  0x29   : > { %s1397_s8 = sand.u32 (!%p1335_p8), 1, %s1244_s19  }
  0x2a   : > { %s984_s10 = sshll.u32 (!%p1335_p8), %s1397_s8, 6  ;;  %s237_s16 = scalar_lea.sflag (!%p1335_p8), [#allocation3], %s1397_s8 }
  0x2b   : > { %s240_s28 = scalar_lea.vmem (!%p1335_p8), [#allocation2], %s984_s10 }
  0x2c   : > { %1227 = dma.done.wait (%p1322_p4), %s237_s16, 1024  }
  0x2d   : > { %1229 = vsyncadd (%p1322_p4), %s237_s16, 4294966272 }
  0x2e   : > { %1231 = dma.done.wait (%p43_p1), [#allocation6], 16384  }
  0x2f   : > { %1233 = vsyncadd (%p43_p1), [#allocation6], 4294950912  ;;  %v1411_v0 = vld [vmem:[%s240_s28] sm:$0xff]  ;;  %v1413_v1 = vld [vmem:[%s240_s28 + $0x8] sm:$0xff]  ;;  %v1258_v16 = vmov 256.0   ;;  %v325_v29 = vlaneseq  ;;  %vm330_vm1 = vcmask 130112  }
  0x30   : > { %v1415_v2 = vld [vmem:[%s240_s28 + $0x20] sm:$0xff]  ;;  %v309_v3 = vmax.f32 %v1411_v0, %v1413_v1  ;;  %v286_v4 = vadd.f32 %v1413_v1, %v1411_v0  ;;  %v1421_v5 = vld [vmem:[%s240_s28 + $0x28] sm:$0xff]  ;;  %v1425_v7 = vld [vmem:[%s240_s28 + $0x10] sm:$0xff]  ;;  %1076 = vrcp.f32 %v1258_v16  ;;  %vm334_vm2 = vcmask 195712   ;;  %s997_s7 = sshll.u32 %s1313_s22, 6  ;;  %s277_s26 = scalar_lea.vmem [#allocation8], %s984_s10 }
  0x31   : > { %v292_v6 = vadd.f32 %v1421_v5, %v1415_v2  ;;  %v1427_v8 = vld [vmem:[%s240_s28 + $0x18] sm:$0xff]  ;;  %v1429_v9 = vld [vmem:[%s240_s28 + $0x30] sm:$0xff]  ;;  %v315_v14 = vmax.f32 %v1415_v2, %v1421_v5  ;;  %v356_v20 = vld [vmem:[%s1553_s1 + $0x8] sm:$0xff]  ;;  %v326_v31 = vand.u32 127, %v325_v29  ;;  %vm338_vm3 = vcmask 261312   ;;  %s879_s24 = scalar_lea.hbm %s1557_s5, %s997_s7  ;;  %s880_s22 = sshll.u32 %s277_s26, 4  ;;  %s881_s22 = int_to_ptr.vmem [resolvable:$true] %s880_s22 }
  0x32   : > { %310 = vmax.xlane.f32.xlu2 %v309_v3  ;;  %287 = vadd.xlane.f32.xlu0 %v286_v4  ;;  %v1431_v10 = vld [vmem:[%s240_s28 + $0x38] sm:$0xff]  ;;  %v312_v11 = vmax.f32 %v1425_v7, %v1427_v8  ;;  %v289_v12 = vadd.f32 %v1427_v8, %v1425_v7  ;;  %v357_v18 = vld [vmem:[%s1553_s1 + $0x10] sm:$0xff]  ;;  %v355_v21 = vld [vmem:[%s1553_s1] sm:$0xff]  ;;  %vm353_vm4 = vcmask 1040384   ;;  %vm359_vm5 = vcmask 261120   ;;  %s882_s29 = sshll.u32 %s879_s24, 4  ;;  %s883_s29 = int_to_ptr.hbm [resolvable:$true] %s882_s29 }
  0x33   : > { %293 = vadd.xlane.f32.xlu1 %v292_v6  ;;  %v295_v13 = vadd.f32 %v1431_v10, %v1429_v9  ;;  %v318_v15 = vmax.f32 %v1429_v9, %v1431_v10  ;;  %v358_v17 = vld [vmem:[%s1553_s1 + $0x18] sm:$0xff]  ;;  %v328_v34 = vadd.s32 4294967288, %v326_v31  ;;  %v332_v37 = vadd.s32 4294967280, %v326_v31  ;;  %v384_v59 = vld [vmem:[%s1554_s2] sm:$0x3]  ;;  %s868_s10 = scalar_lea.sflag [#allocation4], %s1397_s8 }
  0x34   : > { %375 = vmatpush.msra.mxu0 %v358_v17  ;;  %v336_v42 = vadd.s32 4294967272, %v326_v31  ;;  %vm389_vm6 = vcmask 1041408   ;;  %vm385_vm7 = vcmask 15360   ;;  %v1458_v62 = vshrl.u32 %v325_v29, 7  ;;  %v639_v29 = vld [vmem:[#allocation7 + $0x1d0] sm:$0xff]  ;;  %s1196_s11 = sshra.s32 %s883_s29, 4  ;;  %s1197_s11 = int_to_ptr.hbm [resolvable:$true] %s1196_s11 }
  0x35   : > { %989 = vmatpush.msk.msra.mxu1 %vm389_vm6, %v384_v59  ;;  %v597_v59 = vld [vmem:[#allocation7 + $0x80] sm:$0xff]  ;;  %s1198_s9 = scalar_lea.hbm %s1197_s11, 64  ;;  %s1202_s15 = scalar_lea.hbm %s1557_s5, 128 }
  0x36   : > { %376 = vmatpush.msra.mxu0 %v357_v18  ;;  %v1077_v19 = vpop.eup %1076  ;;  %1071 = vset.pattern.permute.xlu2 %v1458_v62  ;;  %v454_v63 = vadd.s32 16, %v1458_v62  ;;  %v448_v3 = vadd.s32 8, %v1458_v62  ;;  %v611_v18 = vld [vmem:[#allocation7 + $0xf0] sm:$0xff]  ;;  %p1199_p1 = scmp.ne.s32.totalorder %s1197_s11, %s1198_s9  ;;  %p1203_p11 = scmp.lt.s32.totalorder %s1197_s11, %s1557_s5 }
  0x37   : > { %v299_v22 = vmul.f32 256.0, %v1077_v19  ;;  %vm303_vm0 = vweird.f32 %v1077_v19  ;;  %645 = vmatpush.msra.mxu2 %v611_v18  ;;  %v624_v18 = vld [vmem:[#allocation7 + $0x158] sm:$0xff]  ;;  %p1204_p2 = scmp.lt.s32.totalorder %s1202_s15, %s1198_s9 }
  0x38   : > { %377 = vmatpush.msra.mxu0 %v356_v20  ;;  %1073 = vset.pattern.permute.xlu1 %v454_v63  ;;  %v612_v20 = vld [vmem:[#allocation7 + $0xf8] sm:$0xff]  ;;  %v630_v63 = vld [vmem:[#allocation7 + $0x188] sm:$0xff]  ;;  %p1200_p4 = pnand %p1199_p1, %p1364_p3 }
  0x39   : > { %v300_v23 = vsub.f32 1.0, %v299_v22  ;;  %1072 = vset.pattern.permute.xlu0 %v448_v3  ;;  %v644_v22 = vld [vmem:[#allocation7 + $0x1f8] sm:$0xff]  ;;  %685 = vmatpush.msrb.mxu1 %v612_v20  ;;  %v595_v3 = vld [vmem:[#allocation7 + $0x70] sm:$0xff]  ;;  %v621_v20 = vld [vmem:[#allocation7 + $0x140] sm:$0xff]  ;;  %p1205_p9 = por %p1204_p2, %p1203_p11 }
  0x3a   : > { %313 = vmax.xlane.f32.xlu2 %v312_v11  ;;  %290 = vadd.xlane.f32.xlu0 %v289_v12  ;;  %p1201_p8 = pneg %p1200_p4 }
  0x3b   : > { %296 = vadd.xlane.f32.xlu1 %v295_v13  ;;  %378 = vmatpush.msra.mxu0 %v355_v21  ;;  %v301_v24 = vmul.f32 %v1077_v19, %v300_v23  ;;  %v609_v23 = vld [vmem:[#allocation7 + $0xe0] sm:$0xff] }
  0x3c   : > { %646 = vmatpush.msra.mxu2 %v609_v23  ;;  %v587_v23 = vld [vmem:[#allocation7 + $0x30] sm:$0xff]  ;;  %p1206_p10 = pnand %p1205_p9, %p1201_p8 }
  0x3d   : > { %v302_v27 = vadd.f32 %v1077_v19, %v301_v24  ;;  %v641_v24 = vld [vmem:[#allocation7 + $0x1e0] sm:$0xff]  ;;  %705 = vmatpush.msrb.mxu0 %v644_v22  ;;  %v622_v22 = vld [vmem:[#allocation7 + $0x148] sm:$0xff] }
  0x3f   : > { %v304_v30 = vsel %vm303_vm0, %v1077_v19, %v302_v27  ;;  %v643_v19 = vld [vmem:[#allocation7 + $0x1f0] sm:$0xff] }
  0x40   : > { %665 = vmatpush.msra.mxu3 %v643_v19  ;;  %v589_v19 = vld [vmem:[#allocation7 + $0x40] sm:$0xff] }
  0x42   : > { %316 = vmax.xlane.f32.xlu0 %v315_v14  ;;  %666 = vmatpush.msra.mxu3 %v641_v24  ;;  %v619_v24 = vld [vmem:[#allocation7 + $0x130] sm:$0xff] }
  0x43   : > { %319 = vmax.xlane.f32.xlu1 %v318_v15 }
  0x44   : > { %667 = vmatpush.msra.mxu3 %v639_v29  ;;  %v586_v29 = vld [vmem:[#allocation7 + $0x28] sm:$0xff] }
  0xa5   : > { %v288_v25 = vpop.xlane.xlu0 %287  ;;  %v311_v26 = vpop.xlane.xlu2 %310 }
  0xa6   : > { %v294_v28 = vpop.xlane.xlu1 %293  ;;  %v305_v32 = vmul.f32 %v304_v30, %v288_v25  ;;  %v345_v44 = vperm.slane %v311_v26, %v326_v31  ;;  %v610_v25 = vld [vmem:[#allocation7 + $0xe8] sm:$0xff] }
  0xa7   : > { %v307_v38 = vmul.f32 %v304_v30, %v294_v28  ;;  %v642_v26 = vld [vmem:[#allocation7 + $0x1e8] sm:$0xff]  ;;  %v607_v28 = vld [vmem:[#allocation7 + $0xd0] sm:$0xff]  ;;  %686 = vmatpush.msrb.mxu1 %v610_v25  ;;  %v588_v25 = vld [vmem:[#allocation7 + $0x38] sm:$0xff] }
  0xa8   : > { %v327_v41 = vperm.slane %v305_v32, %v326_v31  ;;  %706 = vmatpush.msrb.mxu0 %v642_v26  ;;  %v640_v32 = vld [vmem:[#allocation7 + $0x1d8] sm:$0xff]  ;;  %647 = vmatpush.msra.mxu2 %v607_v28  ;;  %v617_v28 = vld [vmem:[#allocation7 + $0x120] sm:$0xff] }
  0xa9   : > { %v333_v47 = vperm.slane %v307_v38, %v332_v37  ;;  %v638_v38 = vld [vmem:[#allocation7 + $0x1c8] sm:$0xff]  ;;  %v620_v26 = vld [vmem:[#allocation7 + $0x138] sm:$0xff] }
  0xaa   : > { %707 = vmatpush.msrb.mxu0 %v640_v32  ;;  %v615_v32 = vld [vmem:[#allocation7 + $0x110] sm:$0xff] }
  0xac   : > { %708 = vmatpush.msrb.mxu0 %v638_v38  ;;  %v614_v38 = vld [vmem:[#allocation7 + $0x108] sm:$0xff] }
  0xad   : > { %v291_v33 = vpop.xlane.xlu0 %290  ;;  %v314_v39 = vpop.xlane.xlu2 %313 }
  0xae   : > { %v306_v35 = vmul.f32 %v304_v30, %v291_v33  ;;  %v297_v36 = vpop.xlane.xlu1 %296  ;;  %v346_v45 = vperm.slane %v314_v39, %v328_v34  ;;  %v605_v33 = vld [vmem:[#allocation7 + $0xc0] sm:$0xff]  ;;  %v603_v39 = vld [vmem:[#allocation7 + $0xb0] sm:$0xff] }
  0xaf   : > { %v308_v43 = vmul.f32 %v304_v30, %v297_v36  ;;  %v608_v30 = vld [vmem:[#allocation7 + $0xd8] sm:$0xff]  ;;  %648 = vmatpush.msra.mxu2 %v605_v33 }
  0xb0   : > { %v329_v40 = vperm.slane %v306_v35, %v328_v34  ;;  %v347_v53 = vsel %vm330_vm1, %v346_v45, %v345_v44  ;;  %v637_v34 = vld [vmem:[#allocation7 + $0x1c0] sm:$0xff]  ;;  %687 = vmatpush.msrb.mxu1 %v608_v30  ;;  %v618_v30 = vld [vmem:[#allocation7 + $0x128] sm:$0xff]  ;;  %v584_v33 = vld [vmem:[#allocation7 + $0x18] sm:$0xff] }
  0xb1   : > { %v337_v48 = vperm.slane %v308_v43, %v336_v42  ;;  %668 = vmatpush.msra.mxu3 %v637_v34  ;;  %v636_v43 = vld [vmem:[#allocation7 + $0x1b8] sm:$0xff]  ;;  %v601_v45 = vld [vmem:[#allocation7 + $0xa0] sm:$0xff]  ;;  %649 = vmatpush.msra.mxu2 %v603_v39  ;;  %v547_v39 = vld [vmem:[#allocation5 + $0xf0] sm:$0xff] }
  0xb2   : > { %v331_v46 = vsel %vm330_vm1, %v329_v40, %v327_v41  ;;  %v635_v40 = vld [vmem:[#allocation7 + $0x1b0] sm:$0xff]  ;;  %709 = vmatpush.msrb.mxu0 %v636_v43  ;;  %v616_v34 = vld [vmem:[#allocation7 + $0x118] sm:$0xff]  ;;  %v545_v43 = vld [vmem:[#allocation5 + $0xe0] sm:$0xff] }
  0xb3   : > { %v335_v52 = vsel %vm334_vm2, %v333_v47, %v331_v46  ;;  %v633_v46 = vld [vmem:[#allocation7 + $0x1a0] sm:$0xff]  ;;  %669 = vmatpush.msra.mxu3 %v635_v40  ;;  %650 = vmatpush.msra.mxu2 %v601_v45  ;;  %v579_v40 = vld [vmem:[#allocation5 + $0x1f0] sm:$0xff]  ;;  %v546_v45 = vld [vmem:[#allocation5 + $0xe8] sm:$0xff] }
  0xb4   : > { %v339_v56 = vsel %vm338_vm3, %v337_v48, %v335_v52  ;;  %v602_v48 = vld [vmem:[#allocation7 + $0xa8] sm:$0xff] }
  0xb5   : > { %v317_v49 = vpop.xlane.xlu0 %316  ;;  %670 = vmatpush.msra.mxu3 %v633_v46  ;;  %v578_v46 = vld [vmem:[#allocation5 + $0x1e8] sm:$0xff] }
  0xb6   : > { %v348_v50 = vperm.slane %v317_v49, %v332_v37  ;;  %v320_v51 = vpop.xlane.xlu1 %319  ;;  %v606_v37 = vld [vmem:[#allocation7 + $0xc8] sm:$0xff] }
  0xb7   : > { %v350_v54 = vperm.slane %v320_v51, %v336_v42  ;;  %v604_v42 = vld [vmem:[#allocation7 + $0xb8] sm:$0xff]  ;;  %688 = vmatpush.msrb.mxu1 %v606_v37  ;;  %v634_v49 = vld [vmem:[#allocation7 + $0x1a8] sm:$0xff] }
  0xb8   : > { %v349_v55 = vsel %vm334_vm2, %v348_v50, %v347_v53  ;;  %710 = vmatpush.msrb.mxu0 %v634_v49  ;;  %v582_v37 = vld [vmem:[#allocation7 + $0x8] sm:$0xff]  ;;  %v544_v49 = vld [vmem:[#allocation5 + $0xd8] sm:$0xff] }
  0xb9   : > { %v351_v57 = vsel %vm338_vm3, %v350_v54, %v349_v55  ;;  %689 = vmatpush.msrb.mxu1 %v604_v42  ;;  %v460_v54 = vadd.s32 24, %v1458_v62  ;;  %v599_v55 = vld [vmem:[#allocation7 + $0x90] sm:$0xff]  ;;  %v596_v62 = vld [vmem:[#allocation7 + $0x78] sm:$0xff] }
  0xba   : > { %v354_v58 = vsel %vm353_vm4, %v339_v56, %v351_v57  ;;  %v631_v56 = vld [vmem:[#allocation7 + $0x190] sm:$0xff]  ;;  %v600_v57 = vld [vmem:[#allocation7 + $0x98] sm:$0xff]  ;;  %651 = vmatpush.msra.mxu2 %v599_v55 }
  0xbb   : > { %988 = vmatmul.msk.f32.vlgmr.msra.gmra.mxu0 %vm359_vm5, %v354_v58  ;;  %690 = vmatpush.msrb.mxu1 %v602_v48  ;;  %v632_v58 = vld [vmem:[#allocation7 + $0x198] sm:$0xff]  ;;  %v575_v48 = vld [vmem:[#allocation5 + $0x1d0] sm:$0xff] }
  0xbc   : > { %671 = vmatpush.msra.mxu3 %v631_v56  ;;  %711 = vmatpush.msrb.mxu0 %v632_v58  ;;  %v580_v42 = vld [vmem:[#allocation5 + $0x1f8] sm:$0xff]  ;;  %v539_v55 = vld [vmem:[#allocation5 + $0xb0] sm:$0xff] }
  0xbd   : > { %691 = vmatpush.msrb.mxu1 %v600_v57  ;;  %652 = vmatpush.msra.mxu2 %v597_v59  ;;  %v571_v56 = vld [vmem:[#allocation5 + $0x1b0] sm:$0xff]  ;;  %v540_v57 = vld [vmem:[#allocation5 + $0xb8] sm:$0xff]  ;;  %v537_v59 = vld [vmem:[#allocation5 + $0xa0] sm:$0xff] }
  0xbe   : > { %712 = vmatpush.msrb.mxu0 %v630_v63  ;;  %v572_v58 = vld [vmem:[#allocation5 + $0x1b8] sm:$0xff]  ;;  %v570_v63 = vld [vmem:[#allocation5 + $0x1a8] sm:$0xff] }
  0xbf   : > { %653 = vmatpush.msra.mxu2 %v595_v3  ;;  %v535_v3 = vld [vmem:[#allocation5 + $0x90] sm:$0xff] }
 0x138   : > { %v380_v60 = vpop.f32.mrf.mxu0 }
 0x139   : > { %v383_v61 = vmax.f32 %v380_v60, 0.0  ;;  %v629_v60 = vld [vmem:[#allocation7 + $0x180] sm:$0xff] }
 0x13a   : > { %672 = vmatpush.msra.mxu3 %v629_v60  ;;  %v569_v60 = vld [vmem:[#allocation5 + $0x1a0] sm:$0xff] }
 0x13b   : > { %990 = vmatmul.msk.f32.vlgmr.msra.gmra.mxu1 %vm385_vm7, %v383_v61  ;;  %v598_v61 = vld [vmem:[#allocation7 + $0x88] sm:$0xff] }
 0x13c   : > { %692 = vmatpush.msrb.mxu1 %v598_v61  ;;  %v538_v61 = vld [vmem:[#allocation5 + $0xa8] sm:$0xff] }
 0x13e   : > { %693 = vmatpush.msrb.mxu1 %v596_v62  ;;  %v536_v62 = vld [vmem:[#allocation5 + $0x98] sm:$0xff] }
 0x1b8   : > { %v410_v4 = vpop.f32.mrf.mxu1 }
 0x1b9   : > { %v414_v6 = vrot.slane %v410_v4, 1 }
 0x1bb   : > { %v1463_v11 = vadd.f32 %v414_v6, %v410_v4  ;;  %v627_v4 = vld [vmem:[#allocation7 + $0x170] sm:$0xff]  ;;  %v628_v6 = vld [vmem:[#allocation7 + $0x178] sm:$0xff] }
 0x1bc   : > { %673 = vmatpush.msra.mxu3 %v627_v4  ;;  %713 = vmatpush.msrb.mxu0 %v628_v6  ;;  %v567_v4 = vld [vmem:[#allocation5 + $0x190] sm:$0xff]  ;;  %v568_v6 = vld [vmem:[#allocation5 + $0x198] sm:$0xff] }
 0x1bd   : > { %v417_v12 = vand.u32 2147483647, %v1463_v11  ;;  %vm421_vm11 = vcmp.ge.f32.partialorder %v1463_v11, 0.0  ;;  %v593_v11 = vld [vmem:[#allocation7 + $0x60] sm:$0xff] }
 0x1be   : > { %654 = vmatpush.msra.mxu2 %v593_v11  ;;  %v533_v11 = vld [vmem:[#allocation5 + $0x80] sm:$0xff] }
 0x1bf   : > { %v418_v13 = vsub.f32 0.0, %v417_v12  ;;  %v625_v12 = vld [vmem:[#allocation7 + $0x160] sm:$0xff] }
 0x1c0   : > { %674 = vmatpush.msra.mxu3 %v625_v12  ;;  %v565_v12 = vld [vmem:[#allocation5 + $0x180] sm:$0xff] }
 0x1c1   : > { %v419_v14 = vmul.f32 1.442695, %v418_v13  ;;  %v594_v13 = vld [vmem:[#allocation7 + $0x68] sm:$0xff] }
 0x1c2   : > { %694 = vmatpush.msrb.mxu1 %v594_v13  ;;  %v534_v13 = vld [vmem:[#allocation5 + $0x88] sm:$0xff] }
 0x1c3   : > { %1078 = vpow2.f32 %v419_v14  ;;  %v626_v14 = vld [vmem:[#allocation7 + $0x168] sm:$0xff] }
 0x1c4   : > { %714 = vmatpush.msrb.mxu0 %v626_v14  ;;  %v566_v14 = vld [vmem:[#allocation5 + $0x188] sm:$0xff] }
 0x1c6   : > { %715 = vmatpush.msrb.mxu0 %v624_v18  ;;  %v564_v18 = vld [vmem:[#allocation5 + $0x178] sm:$0xff] }
 0x1c8   : > { %716 = vmatpush.msrb.mxu0 %v622_v22  ;;  %v562_v22 = vld [vmem:[#allocation5 + $0x168] sm:$0xff] }
 0x1c9   : > { %v1079_v15 = vpop.eup %1078 }
 0x1ca   : > { %v423_v16 = vadd.f32 1.0, %v1079_v15  ;;  %v422_v50 = vsel %vm421_vm11, 1.0, %v1079_v15  ;;  %v591_v15 = vld [vmem:[#allocation7 + $0x50] sm:$0xff]  ;;  %717 = vmatpush.msrb.mxu0 %v620_v26  ;;  %v560_v26 = vld [vmem:[#allocation5 + $0x158] sm:$0xff] }
 0x1cb   : > { %655 = vmatpush.msra.mxu2 %v591_v15  ;;  %v531_v15 = vld [vmem:[#allocation5 + $0x70] sm:$0xff] }
 0x1cc   : > { %1080 = vrcp.f32 %v423_v16  ;;  %v435_v31 = vand.u32 2147483648, %v423_v16  ;;  %v433_v36 = vand.u32 2147483647, %v423_v16  ;;  %vm429_vm9 = vweird.f32 %v423_v16  ;;  %718 = vmatpush.msrb.mxu0 %v618_v30  ;;  %v558_v30 = vld [vmem:[#allocation5 + $0x148] sm:$0xff] }
 0x1cd   : > { %656 = vmatpush.msra.mxu2 %v589_v19  ;;  %v529_v19 = vld [vmem:[#allocation5 + $0x60] sm:$0xff] }
 0x1ce   : > { %v436_v44 = vor.u32 1.1754944e-38, %v435_v31  ;;  %vm434_vm12 = vcmp.eq.f32.partialorder %v433_v36, 8.507059e+37  ;;  %v583_v31 = vld [vmem:[#allocation7 + $0x10] sm:$0xff]  ;;  %v613_v36 = vld [vmem:[#allocation7 + $0x100] sm:$0xff]  ;;  %719 = vmatpush.msrb.mxu0 %v616_v34  ;;  %v556_v34 = vld [vmem:[#allocation5 + $0x138] sm:$0xff] }
 0x1cf   : > { %657 = vmatpush.msra.mxu2 %v587_v23  ;;  %v527_v23 = vld [vmem:[#allocation5 + $0x50] sm:$0xff] }
 0x1d0   : > { %720 = vmatpush.msrb.mxu0 %v614_v38  ;;  %v522_v38 = vld [vmem:[#allocation5 + $0x28] sm:$0xff] }
 0x1d2   : > { %v1081_v17 = vpop.eup %1080  ;;  %785 = vmatpush.msra.mxu0 %v580_v42  ;;  %v520_v42 = vld [vmem:[#allocation5 + $0x18] sm:$0xff] }
 0x1d3   : > { %v425_v21 = vmul.f32 %v1081_v17, %v423_v16  ;;  %vm430_vm8 = vweird.f32 %v1081_v17  ;;  %v623_v16 = vld [vmem:[#allocation7 + $0x150] sm:$0xff] }
 0x1d4   : > { %vm431_vm10 = vmor %vm429_vm9, %vm430_vm8  ;;  %675 = vmatpush.msra.mxu3 %v623_v16  ;;  %786 = vmatpush.msra.mxu0 %v578_v46  ;;  %v563_v16 = vld [vmem:[#allocation5 + $0x170] sm:$0xff]  ;;  %v518_v46 = vld [vmem:[#allocation5 + $0x8] sm:$0xff] }
 0x1d5   : > { %v426_v27 = vsub.f32 1.0, %v425_v21  ;;  %v590_v21 = vld [vmem:[#allocation7 + $0x48] sm:$0xff] }
 0x1d6   : > { %676 = vmatpush.msra.mxu3 %v621_v20  ;;  %v561_v20 = vld [vmem:[#allocation5 + $0x160] sm:$0xff] }
 0x1d7   : > { %v427_v35 = vmul.f32 %v1081_v17, %v426_v27  ;;  %v585_v27 = vld [vmem:[#allocation7 + $0x20] sm:$0xff] }
 0x1d8   : > { %677 = vmatpush.msra.mxu3 %v619_v24  ;;  %658 = vmatpush.msra.mxu2 %v585_v27  ;;  %v559_v24 = vld [vmem:[#allocation5 + $0x150] sm:$0xff]  ;;  %v525_v27 = vld [vmem:[#allocation5 + $0x40] sm:$0xff] }
 0x1d9   : > { %v428_v41 = vadd.f32 %v1081_v17, %v427_v35  ;;  %v581_v35 = vld [vmem:[#allocation7] sm:$0xff] }
 0x1da   : > { %678 = vmatpush.msra.mxu3 %v617_v28  ;;  %659 = vmatpush.msra.mxu2 %v583_v31  ;;  %v557_v28 = vld [vmem:[#allocation5 + $0x140] sm:$0xff]  ;;  %v523_v31 = vld [vmem:[#allocation5 + $0x30] sm:$0xff] }
 0x1db   : > { %v432_v47 = vsel %vm431_vm10, %v1081_v17, %v428_v41  ;;  %v592_v17 = vld [vmem:[#allocation7 + $0x58] sm:$0xff] }
 0x1dc   : > { %v437_v51 = vsel %vm434_vm12, %v436_v44, %v432_v47  ;;  %695 = vmatpush.msrb.mxu1 %v592_v17  ;;  %679 = vmatpush.msra.mxu3 %v615_v32  ;;  %v548_v41 = vld [vmem:[#allocation5 + $0xf8] sm:$0xff]  ;;  %v577_v44 = vld [vmem:[#allocation5 + $0x1e0] sm:$0xff]  ;;  %v543_v47 = vld [vmem:[#allocation5 + $0xd0] sm:$0xff] }
 0x1dd   : > { %v438_v52 = vmul.f32 %v437_v51, %v422_v50  ;;  %660 = vmatpush.msra.mxu2 %v581_v35  ;;  %v576_v50 = vld [vmem:[#allocation5 + $0x1d8] sm:$0xff]  ;;  %v541_v51 = vld [vmem:[#allocation5 + $0xc0] sm:$0xff]  ;;  %v555_v32 = vld [vmem:[#allocation5 + $0x130] sm:$0xff] }
 0x1de   : > { %696 = vmatpush.msrb.mxu1 %v590_v21  ;;  %680 = vmatpush.msra.mxu3 %v613_v36  ;;  %v532_v17 = vld [vmem:[#allocation5 + $0x78] sm:$0xff]  ;;  %v530_v21 = vld [vmem:[#allocation5 + $0x68] sm:$0xff]  ;;  %v521_v35 = vld [vmem:[#allocation5 + $0x20] sm:$0xff] }
 0x1df   : > { %v439_v53 = vperm.slane %v438_v52, 0  ;;  %725 = vmatpush.msrb.mxu2 %v547_v39  ;;  %v573_v52 = vld [vmem:[#allocation5 + $0x1c0] sm:$0xff]  ;;  %787 = vmatpush.msra.mxu0 %v576_v50  ;;  %v554_v39 = vld [vmem:[#allocation5 + $0x128] sm:$0xff] }
 0x1e0   : > { %697 = vmatpush.msrb.mxu1 %v588_v25  ;;  %745 = vmatpush.msrb.mxu3 %v579_v40  ;;  %v528_v25 = vld [vmem:[#allocation5 + $0x58] sm:$0xff]  ;;  %v553_v36 = vld [vmem:[#allocation5 + $0x120] sm:$0xff]  ;;  %v519_v40 = vld [vmem:[#allocation5 + $0x10] sm:$0xff] }
 0x1e1   : > { %456 = vperm.xlu1 %1073, %v439_v53   ;;  %450 = vperm.xlu0 %1072, %v439_v53  }
 0x1e2   : > { %444 = vperm.xlu2 %1071, %v439_v53   ;;  %698 = vmatpush.msrb.mxu1 %v586_v29  ;;  %v526_v29 = vld [vmem:[#allocation5 + $0x48] sm:$0xff] }
 0x1e3   : > { %726 = vmatpush.msrb.mxu2 %v545_v43  ;;  %746 = vmatpush.msrb.mxu3 %v577_v44  ;;  %v552_v43 = vld [vmem:[#allocation5 + $0x118] sm:$0xff]  ;;  %v517_v44 = vld [vmem:[#allocation5] sm:$0xff] }
 0x1e4   : > { %699 = vmatpush.msrb.mxu1 %v584_v33  ;;  %v524_v33 = vld [vmem:[#allocation5 + $0x38] sm:$0xff] }
 0x1e5   : > { %727 = vmatpush.msrb.mxu2 %v543_v47  ;;  %747 = vmatpush.msrb.mxu3 %v575_v48  ;;  %v550_v47 = vld [vmem:[#allocation5 + $0x108] sm:$0xff]  ;;  %v1259_v48 = vmov 32.0  }
 0x1e6   : > { %700 = vmatpush.msrb.mxu1 %v582_v37  ;;  %1082 = vrcp.f32 %v1259_v48 }
 0x1e7   : > { %728 = vmatpush.msrb.mxu2 %v541_v51  ;;  %748 = vmatpush.msrb.mxu3 %v573_v52 }
 0x1e8   : > { %765 = vmatpush.msra.mxu1 %v548_v41  ;;  %v551_v41 = vld [vmem:[#allocation5 + $0x110] sm:$0xff] }
 0x1e9   : > { %1075 = vset.pattern.permute.xlu0 %v460_v54  ;;  %729 = vmatpush.msrb.mxu2 %v539_v55 }
 0x1ea   : > { %1074 = vset.pattern.permute.xlu2 %v460_v54  ;;  %766 = vmatpush.msra.mxu1 %v546_v45  ;;  %v574_v54 = vld [vmem:[#allocation5 + $0x1c8] sm:$0xff]  ;;  %v549_v45 = vld [vmem:[#allocation5 + $0x100] sm:$0xff] }
 0x1eb   : > { %788 = vmatpush.msra.mxu0 %v574_v54  ;;  %749 = vmatpush.msrb.mxu3 %v571_v56 }
 0x1ec   : > { %767 = vmatpush.msra.mxu1 %v544_v49  ;;  %730 = vmatpush.msrb.mxu2 %v537_v59 }
 0x1ed   : > { %789 = vmatpush.msra.mxu0 %v572_v58  ;;  %750 = vmatpush.msrb.mxu3 %v569_v60 }
 0x1ee   : > { %731 = vmatpush.msrb.mxu2 %v535_v3 }
 0x1ef   : > { %790 = vmatpush.msra.mxu0 %v570_v63  ;;  %751 = vmatpush.msrb.mxu3 %v567_v4 }
 0x1f0   : > { %732 = vmatpush.msrb.mxu2 %v533_v11 }
 0x1f1   : > { %791 = vmatpush.msra.mxu0 %v568_v6  ;;  %752 = vmatpush.msrb.mxu3 %v565_v12 }
 0x1f2   : > { %462 = vperm.xlu2 %1074, %v439_v53   ;;  %v542_v53 = vld [vmem:[#allocation5 + $0xc8] sm:$0xff]  ;;  %733 = vmatpush.msrb.mxu2 %v531_v15 }
 0x1f3   : > { %768 = vmatpush.msra.mxu1 %v542_v53  ;;  %792 = vmatpush.msra.mxu0 %v566_v14 }
 0x1f4   : > { %753 = vmatpush.msrb.mxu3 %v563_v16  ;;  %734 = vmatpush.msrb.mxu2 %v529_v19 }
 0x1f5   : > { %769 = vmatpush.msra.mxu1 %v540_v57  ;;  %793 = vmatpush.msra.mxu0 %v564_v18 }
 0x1f6   : > { %754 = vmatpush.msrb.mxu3 %v561_v20  ;;  %735 = vmatpush.msrb.mxu2 %v527_v23 }
 0x1f7   : > { %770 = vmatpush.msra.mxu1 %v538_v61  ;;  %794 = vmatpush.msra.mxu0 %v562_v22 }
 0x1f8   : > { %755 = vmatpush.msrb.mxu3 %v559_v24  ;;  %736 = vmatpush.msrb.mxu2 %v525_v27 }
 0x1f9   : > { %771 = vmatpush.msra.mxu1 %v536_v62  ;;  %795 = vmatpush.msra.mxu0 %v560_v26 }
 0x1fa   : > { %756 = vmatpush.msrb.mxu3 %v557_v28  ;;  %737 = vmatpush.msrb.mxu2 %v523_v31 }
 0x1fb   : > { %772 = vmatpush.msra.mxu1 %v534_v13  ;;  %796 = vmatpush.msra.mxu0 %v558_v30 }
 0x1fc   : > { %757 = vmatpush.msrb.mxu3 %v555_v32  ;;  %738 = vmatpush.msrb.mxu2 %v521_v35 }
 0x1fd   : > { %773 = vmatpush.msra.mxu1 %v532_v17  ;;  %797 = vmatpush.msra.mxu0 %v556_v34 }
 0x1fe   : > { %758 = vmatpush.msrb.mxu3 %v553_v36  ;;  %739 = vmatpush.msrb.mxu2 %v519_v40 }
 0x1ff   : > { %774 = vmatpush.msra.mxu1 %v530_v21  ;;  %798 = vmatpush.msra.mxu0 %v554_v39 }
 0x200   : > { %759 = vmatpush.msrb.mxu3 %v551_v41  ;;  %740 = vmatpush.msrb.mxu2 %v517_v44 }
 0x201   : > { %775 = vmatpush.msra.mxu1 %v528_v25  ;;  %799 = vmatpush.msra.mxu0 %v552_v43 }
 0x202   : > { %760 = vmatpush.msrb.mxu3 %v549_v45 }
 0x203   : > { %776 = vmatpush.msra.mxu1 %v526_v29  ;;  %800 = vmatpush.msra.mxu0 %v550_v47 }
 0x205   : > { %777 = vmatpush.msra.mxu1 %v524_v33 }
 0x207   : > { %778 = vmatpush.msra.mxu1 %v522_v38 }
 0x209   : > { %779 = vmatpush.msra.mxu1 %v520_v42 }
 0x20b   : > { %780 = vmatpush.msra.mxu1 %v518_v46 }
 0x23c   : > { %v445_v37 = vpop.permute.xlu2 %444 }
 0x23d   : > { %v1470_v50 = vmul.f32 %v445_v37, %v1411_v0  ;;  %v1473_v51 = vmul.f32 %v445_v37, %v1413_v1 }
 0x24c   : > { %v463_v49 = vpop.permute.xlu2 %462 }
 0x24d   : > { %v1488_v0 = vmul.f32 %v463_v49, %v1429_v9  ;;  %v1491_v1 = vmul.f32 %v463_v49, %v1431_v10 }
 0x253   : > { %v457_v52 = vpop.permute.xlu1 %456  ;;  %v451_v53 = vpop.permute.xlu0 %450 }
 0x254   : > { %v1476_v54 = vmul.f32 %v457_v52, %v1415_v2  ;;  %v1479_v55 = vmul.f32 %v457_v52, %v1421_v5  ;;  %v1482_v56 = vmul.f32 %v451_v53, %v1425_v7  ;;  %v1485_v57 = vmul.f32 %v451_v53, %v1427_v8  ;;  %v1083_v8 = vpop.eup %1082 }
 0x255   : > { %v491_v62 = vmul.f32 32.0, %v1083_v8  ;;  %vm495_vm13 = vweird.f32 %v1083_v8 }
 0x256   : > { %v499_v58 = vmax.f32 %v1470_v50, %v1476_v54  ;;  %v508_v2 = vmax.f32 %v1473_v51, %v1479_v55  ;;  %v472_v5 = vadd.f32 %v1482_v56, %v1470_v50  ;;  %v481_v7 = vadd.f32 %v1485_v57, %v1473_v51 }
 0x257   : > { %v500_v9 = vmax.f32 %v1482_v56, %v1488_v0  ;;  %v509_v10 = vmax.f32 %v1485_v57, %v1491_v1  ;;  %v492_v17 = vsub.f32 1.0, %v491_v62 }
 0x258   : > { %v473_v59 = vadd.f32 %v472_v5, %v1476_v54  ;;  %v482_v60 = vadd.f32 %v481_v7, %v1479_v55 }
 0x259   : > { %v501_v61 = vmax.f32 %v499_v58, %v500_v9  ;;  %v510_v63 = vmax.f32 %v508_v2, %v509_v10  ;;  %v493_v26 = vmul.f32 %v1083_v8, %v492_v17 }
 0x25a   : > { %v474_v3 = vadd.f32 %v473_v59, %v1488_v0  ;;  %v483_v4 = vadd.f32 %v482_v60, %v1491_v1 }
 0x25b   : > { %v502_v6 = vrot.slane %v501_v61, 4  ;;  %v511_v11 = vrot.slane %v510_v63, 4  ;;  %v494_v34 = vadd.f32 %v1083_v8, %v493_v26 }
 0x25c   : > { %v475_v12 = vrot.slane %v474_v3, 4  ;;  %v484_v13 = vrot.slane %v483_v4, 4 }
 0x25d   : > { %v503_v14 = vmax.f32 %v501_v61, %v502_v6  ;;  %v512_v15 = vmax.f32 %v510_v63, %v511_v11  ;;  %v496_v37 = vsel %vm495_vm13, %v1083_v8, %v494_v34 }
 0x25e   : > { %v476_v16 = vadd.f32 %v475_v12, %v474_v3  ;;  %v485_v18 = vadd.f32 %v484_v13, %v483_v4 }
 0x25f   : > { %v504_v19 = vrot.slane %v503_v14, 2  ;;  %v513_v20 = vrot.slane %v512_v15, 2 }
 0x260   : > { %v477_v21 = vrot.slane %v476_v16, 2  ;;  %v486_v22 = vrot.slane %v485_v18, 2 }
 0x261   : > { %v505_v23 = vmax.f32 %v503_v14, %v504_v19  ;;  %v514_v24 = vmax.f32 %v512_v15, %v513_v20 }
 0x262   : > { %v478_v25 = vadd.f32 %v477_v21, %v476_v16  ;;  %v487_v27 = vadd.f32 %v486_v22, %v485_v18 }
 0x263   : > { %v506_v28 = vrot.slane %v505_v23, 1  ;;  %v515_v29 = vrot.slane %v514_v24, 1 }
 0x264   : > { %v479_v32 = vrot.slane %v478_v25, 1  ;;  %v488_v33 = vrot.slane %v487_v27, 1 }
 0x265   : > { %v507_v30 = vmax.f32 %v505_v23, %v506_v28  ;;  %v516_v31 = vmax.f32 %v514_v24, %v515_v29 }
 0x266   : > { %v480_v35 = vadd.f32 %v479_v32, %v478_v25  ;;  %v489_v36 = vadd.f32 %v488_v33, %v487_v27 }
 0x267   : > { %661 = vmatmul.f32.vlgmr.msra.gmra.mxu2 %v507_v30  ;;  %681 = vmatmul.f32.vlgmr.msra.gmra.mxu3 %v516_v31 }
 0x268   : > { %701 = vmatmul.f32.vlgmr.msrb.gmra.mxu1 %v507_v30  ;;  %721 = vmatmul.f32.vlgmr.msrb.gmra.mxu0 %v516_v31  ;;  %v497_v38 = vmul.f32 %v496_v37, %v480_v35  ;;  %v498_v39 = vmul.f32 %v496_v37, %v489_v36 }
 0x26f   : > { %741 = vmatmul.f32.vlgmr.msrb.gmra.mxu2 %v497_v38  ;;  %761 = vmatmul.f32.vlgmr.msrb.gmra.mxu3 %v498_v39 }
 0x270   : > { %781 = vmatmul.f32.vlgmr.msra.gmra.mxu1 %v497_v38  ;;  %801 = vmatmul.f32.vlgmr.msra.gmra.mxu0 %v498_v39 }
 0x2e5   : > { %v702_v40 = vpop.f32.mrf.mxu1  ;;  %v722_v41 = vpop.f32.mrf.mxu0 }
 0x2e6   : > { %v723_v44 = vadd.f32 %v722_v41, %v702_v40 }
 0x2ea   : > { %v662_v42 = vpop.f32.mrf.mxu2  ;;  %v682_v43 = vpop.f32.mrf.mxu3 }
 0x2eb   : > { %v683_v49 = vadd.f32 %v682_v43, %v662_v42 }
 0x2ed   : > { %v782_v45 = vpop.f32.mrf.mxu1  ;;  %v802_v47 = vpop.f32.mrf.mxu0 }
 0x2ee   : > { %v783_v46 = vadd.f32 %v782_v45, %v723_v44 }
 0x2f0   : > { %v803_v48 = vadd.f32 %v802_v47, %v783_v46 }
 0x2f2   : > { %v806_v52 = vand.u32 2147483647, %v803_v48  ;;  %v742_v53 = vpop.f32.mrf.mxu2  ;;  %v762_v5 = vpop.f32.mrf.mxu3  ;;  %vm814_vm0 = vcmp.ge.f32.partialorder %v803_v48, 0.0 }
 0x2f3   : > { %v743_v58 = vadd.f32 %v742_v53, %v683_v49 }
 0x2f4   : > { %v808_v2 = vsub.f32 0.0, %v806_v52 }
 0x2f5   : > { %v763_v7 = vadd.f32 %v762_v5, %v743_v58 }
 0x2f6   : > { %v811_v8 = vmul.f32 1.442695, %v808_v2 }
 0x2f7   : > { %v805_v9 = vand.u32 2147483647, %v763_v7  ;;  %vm813_vm6 = vcmp.ge.f32.partialorder %v763_v7, 0.0 }
 0x2f8   : > { %1084 = vpow2.f32 %v811_v8 }
 0x2f9   : > { %v807_v10 = vsub.f32 0.0, %v805_v9 }
 0x2fb   : > { %v809_v59 = vmul.f32 1.442695, %v807_v10 }
 0x2fd   : > { %1086 = vpow2.f32 %v809_v59 }
 0x2fe   : > { %v1085_v60 = vpop.eup %1084 }
 0x2ff   : > { %v818_v61 = vadd.f32 1.0, %v1085_v60  ;;  %v816_v19 = vsel %vm814_vm0, 1.0, %v1085_v60 }
 0x301   : > { %1088 = vrcp.f32 %v818_v61  ;;  %v845_v11 = vand.u32 2147483648, %v818_v61  ;;  %v843_v14 = vand.u32 2147483647, %v818_v61  ;;  %vm839_vm15 = vweird.f32 %v818_v61 }
 0x303   : > { %v1087_v63 = vpop.eup %1086  ;;  %v846_v17 = vor.u32 1.1754944e-38, %v845_v11  ;;  %vm844_vm2 = vcmp.eq.f32.partialorder %v843_v14, 8.507059e+37 }
 0x304   : > { %v817_v3 = vadd.f32 1.0, %v1087_v63  ;;  %v815_v34 = vsel %vm813_vm6, 1.0, %v1087_v63 }
 0x306   : > { %1090 = vrcp.f32 %v817_v3  ;;  %v830_v23 = vand.u32 2147483648, %v817_v3  ;;  %v828_v25 = vand.u32 2147483647, %v817_v3  ;;  %vm824_vm4 = vweird.f32 %v817_v3 }
 0x307   : > { %v1089_v4 = vpop.eup %1088 }
 0x308   : > { %v835_v62 = vmul.f32 %v1089_v4, %v818_v61  ;;  %vm840_vm14 = vweird.f32 %v1089_v4  ;;  %v831_v29 = vor.u32 1.1754944e-38, %v830_v23  ;;  %vm829_vm7 = vcmp.eq.f32.partialorder %v828_v25, 8.507059e+37 }
 0x309   : > { %vm841_vm1 = vmor %vm839_vm15, %vm840_vm14 }
 0x30a   : > { %v836_v6 = vsub.f32 1.0, %v835_v62 }
 0x30c   : > { %v1091_v12 = vpop.eup %1090  ;;  %v837_v13 = vmul.f32 %v1089_v4, %v836_v6 }
 0x30d   : > { %v820_v15 = vmul.f32 %v1091_v12, %v817_v3  ;;  %vm825_vm3 = vweird.f32 %v1091_v12 }
 0x30e   : > { %v838_v16 = vadd.f32 %v1089_v4, %v837_v13  ;;  %vm826_vm5 = vmor %vm824_vm4, %vm825_vm3 }
 0x30f   : > { %v821_v18 = vsub.f32 1.0, %v820_v15 }
 0x310   : > { %v842_v20 = vsel %vm841_vm1, %v1089_v4, %v838_v16 }
 0x311   : > { %v847_v21 = vsel %vm844_vm2, %v846_v17, %v842_v20  ;;  %v822_v22 = vmul.f32 %v1091_v12, %v821_v18 }
 0x312   : > { %v848_v24 = vmul.f32 %v847_v21, %v816_v19 }
 0x313   : > { %v823_v26 = vadd.f32 %v1091_v12, %v822_v22 }
 0x314   : > { %v850_v27 = vperm.slane %v848_v24, 0 }
 0x315   : > { %v827_v28 = vsel %vm826_vm5, %v1091_v12, %v823_v26 }
 0x316   : > { %v852_v30 = vmul.f32 %v850_v27, %v1473_v51  ;;  %v854_v31 = vmul.f32 %v850_v27, %v1485_v57  ;;  %v856_v32 = vmul.f32 %v850_v27, %v1479_v55  ;;  %v858_v33 = vmul.f32 %v850_v27, %v1491_v1 }
 0x317   : > { %v832_v35 = vsel %vm829_vm7, %v831_v29, %v827_v28 }
 0x318   : > { %860 = vst [vmem:[%s277_s26 + $0x8] sm:$0xff] %v852_v30  ;;  %v833_v36 = vmul.f32 %v832_v35, %v815_v34 }
 0x319   : > { %862 = vst [vmem:[%s277_s26 + $0x18] sm:$0xff] %v854_v31 }
 0x31a   : > { %864 = vst [vmem:[%s277_s26 + $0x28] sm:$0xff] %v856_v32  ;;  %v849_v51 = vperm.slane %v833_v36, 0 }
 0x31b   : > { %866 = vst [vmem:[%s277_s26 + $0x38] sm:$0xff] %v858_v33 }
 0x31c   : > { %v851_v55 = vmul.f32 %v849_v51, %v1470_v50  ;;  %v853_v57 = vmul.f32 %v849_v51, %v1482_v56  ;;  %v855_v1 = vmul.f32 %v849_v51, %v1476_v54  ;;  %v857_v37 = vmul.f32 %v849_v51, %v1488_v0 }
 0x31e   : > { %859 = vst [vmem:[%s277_s26] sm:$0xff] %v851_v55 }
 0x31f   : > { %861 = vst [vmem:[%s277_s26 + $0x10] sm:$0xff] %v853_v57 }
 0x320   : > { %863 = vst [vmem:[%s277_s26 + $0x20] sm:$0xff] %v855_v1 }
 0x321   : > { %865 = vst [vmem:[%s277_s26 + $0x30] sm:$0xff] %v857_v37 }
 0x322   : > { %1209 = shalt.err (!%p1206_p10)
}
 0x323   : > { %s1260_s8 = smov 256   ;;  %s1261_s6 = smov 16  }
 0x324   : > { %1008 = dma.vmem_to_hbm [thread:$0]  (%p1364_p3), %s881_s22, 1024, %s883_s29, %s868_s10, %s1260_s8, %s1260_s8, %s1261_s6  }
 0x325 PF: > { %s897_s7 = sand.u32 1, %s1240_s18   ;;  %p1565_p12 = scmp.ge.s32.totalorder %s1252_s21, 2 }
 0x326   : > { %s898_s26 = scalar_lea.sflag [#allocation4], %s897_s7 }
 0x327   : > { %p1022_p13 = pnand %p1565_p12, %p1327_p6 }
 0x329   : > { %p1023_p0 = pneg %p1022_p13 }
 0x32b   : > { %1235 = dma.done.wait (%p1023_p0), %s898_s26, 1024  }
 0x32c   : > { %1237 = vsyncadd (%p1023_p0), %s898_s26, 4294966272  ;;  %p19_p5 = scmp.ge.s32.totalorder %s1354_s14, 4   ;;  %s1566_s18 = smov %s1244_s19 }
 0x32d   : > { %s1567_s19 = smov %s1248_s20  ;;  %s1568_s20 = smov %s1370_s23 }
 0x32e   : > { %s1569_s21 = smov %s1354_s14  ;;  %21 = sbr.rel (!%p19_p5) target bundleno = 6 (0x6), region = 93 }
 0x333   :  { %904 = vsyncpa [#allocation3], 1 }
 0x334   :  { %906 = vsyncpa [#allocation3 + $0x1], 1 }
 0x335   :  { %907 = vsyncpa [#allocation6], 1 }
 0x336   :  { %908 = vsyncpa [#allocation4], 1 }
 0x337   :  { %910 = vsyncpa [#allocation4 + $0x1], 1 }

</bundles_post_ra>
